<compile_context>
chip_gen: v6e
topology: v6e:2x2x1
jax: 0.10.0
libtpu: 0.0.40
codegen_flags: <defaults>
</compile_context>

<pallas_src>
import functools

import jax
import jax.numpy as jnp
from jax.experimental import pallas as pl
from jax.experimental.pallas import tpu as pltpu


INPUT_DIM = 259
HIDDEN_DIM = 128
_K_MAIN = (INPUT_DIM // 128) * 128   # 256: MXU-friendly part of the fc1 contraction
MAX_TILE = 4096                      # VMEM-safe even on v7x (64 MiB physical VMEM)


def _round_up(n, m):
    return ((n + m - 1) // m) * m


def _critic_kernel(x_ref, w1_ref, b1_ref, w2_ref, b2_ref, w3_ref, b3_ref, out_ref):
    # x_ref: (TB, 259) tile (f32 or bf16).  Rows past the true batch in the
    # ragged last block contain garbage; they are computed and then dropped
    # because the output write-back is clipped to the (B, 1) array bounds.
    x = x_ref[...]

    # ---- fc1 + relu: MXU on the first 256 features (full K passes), VPU
    # rank-1 broadcast-FMAs on the 3-feature tail.
    acc = jnp.dot(x[:, :_K_MAIN].astype(jnp.bfloat16), w1_ref[:_K_MAIN, :],
                  preferred_element_type=jnp.float32)
    for j in range(_K_MAIN, INPUT_DIM):
        acc += x[:, j:j + 1].astype(jnp.float32) * w1_ref[j, :].astype(jnp.float32)
    h = jnp.maximum(acc + b1_ref[...], 0.0)

    # ---- fc2 + relu
    h = jnp.dot(h.astype(jnp.bfloat16), w2_ref[...],
                preferred_element_type=jnp.float32) + b2_ref[...]
    h = jnp.maximum(h, 0.0)

    # ---- value head: (TB, H) @ (H, 1).  h streams through the MXU; the tiny
    # W3 column is the latched operand (no transpose / re-latch of h).
    v = jnp.dot(h.astype(jnp.bfloat16), w3_ref[...],
                preferred_element_type=jnp.float32) + b3_ref[...]
    out_ref[...] = v.astype(out_ref.dtype)


def _tensorcores_per_chip():
    """2 on chips with two TensorCores per chip (v7x family), else 1."""
    try:
        kind = jax.devices()[0].device_kind.lower()
    except Exception:
        return 1
    return 2 if ("v7" in kind or "tpu7" in kind) else 1


def _choose_tile(batch, batch_tile, n_cores):
    """Batch tile: large (amortizes ~0.35us/step), multiple of 8, VMEM-capped,
    and (only on 2-TC chips) shaped so the tile count is a multiple of the
    TensorCore count, keeping megacore work balanced."""
    b8 = _round_up(max(batch, 1), 8)
    tile = max(8, min(_round_up(max(batch_tile, 8), 8), b8, MAX_TILE))
    if n_cores > 1 and batch >= 8 * n_cores:
        n = pl.cdiv(batch, tile)
        n_bal = _round_up(max(n, n_cores), n_cores)
        if n_bal != n:
            tile = max(8, _round_up(pl.cdiv(batch, n_bal), 8))
    return tile


@functools.partial(jax.jit, static_argnames=("batch_tile",))
def critic_forward(x, params, batch_tile=2048):
    """x: (B, 259) float32 or bfloat16 -> (B, 1) float32."""
    w1, b1, w2, b2, w3, b3 = params
    B, D = x.shape
    assert D == INPUT_DIM
    H = HIDDEN_DIM

    # Weights are tiny (~100 KB as bf16) and grid-invariant: cast once here and
    # they stay resident in VMEM across all grid steps (constant index_maps).
    w1b = w1.astype(jnp.bfloat16)
    w2b = w2.astype(jnp.bfloat16)
    w3b = w3.reshape(H, 1).astype(jnp.bfloat16)     # PyTorch (1, H) -> (H, 1)
    b1f = b1.reshape(1, H).astype(jnp.float32)
    b2f = b2.reshape(1, H).astype(jnp.float32)
    b3f = b3.reshape(1, 1).astype(jnp.float32)

    tile = _choose_tile(B, batch_tile, _tensorcores_per_chip())
    grid = (pl.cdiv(B, tile),)      # ragged last block; no jnp.pad copy of x

    return pl.pallas_call(
        _critic_kernel,
        out_shape=jax.ShapeDtypeStruct((B, 1), jnp.float32),
        grid_spec=pltpu.PrefetchScalarGridSpec(
            num_scalar_prefetch=0,
            grid=grid,
            in_specs=[
                # streaming activations, tiled over the batch axis
                pl.BlockSpec((tile, INPUT_DIM), lambda i: (i, 0)),
                # grid-invariant weights / biases, resident in VMEM
                pl.BlockSpec((INPUT_DIM, H), lambda i: (0, 0)),
                pl.BlockSpec((1, H), lambda i: (0, 0)),
                pl.BlockSpec((H, H), lambda i: (0, 0)),
                pl.BlockSpec((1, H), lambda i: (0, 0)),
                pl.BlockSpec((H, 1), lambda i: (0, 0)),
                pl.BlockSpec((1, 1), lambda i: (0, 0)),
            ],
            out_specs=pl.BlockSpec((tile, 1), lambda i: (i, 0)),
        ),
        compiler_params=pltpu.CompilerParams(
            dimension_semantics=("parallel",),
            vmem_limit_bytes=32 * 1024 * 1024,
        ),
    )(x, w1b, b1f, w2b, b2f, w3b, b3f)


def init_params(key, input_dim=INPUT_DIM, hidden_dim=HIDDEN_DIM):
    """nn.Linear-style U(-1/sqrt(fan_in), +1/sqrt(fan_in)) init.

    W1/W2 are stored as (in_dim, out_dim) (transpose of PyTorch) so the kernel
    does x @ W directly; W3 is stored as (1, hidden), PyTorch's own layout for
    nn.Linear(hidden, 1).weight.  All master params are f32.
    """
    keys = jax.random.split(key, 6)

    def linear(kw, kb, fan_in, fan_out, transpose=True):
        bound = 1.0 / jnp.sqrt(jnp.float32(fan_in))
        shape = (fan_in, fan_out) if transpose else (fan_out, fan_in)
        w = jax.random.uniform(kw, shape, jnp.float32, -bound, bound)
        b = jax.random.uniform(kb, (1, fan_out), jnp.float32, -bound, bound)
        return w, b

    w1, b1 = linear(keys[0], keys[1], input_dim, hidden_dim)            # (259,128),(1,128)
    w2, b2 = linear(keys[2], keys[3], hidden_dim, hidden_dim)           # (128,128),(1,128)
    w3, b3 = linear(keys[4], keys[5], hidden_dim, 1, transpose=False)   # (1,128),(1,1)
    return (w1, b1, w2, b2, w3, b3)


def critic_reference(x, params):
    """Pure-JAX f32 reference of the PyTorch forward, for verification."""
    w1, b1, w2, b2, w3, b3 = params
    h1 = jnp.maximum(x @ w1 + b1, 0.0)
    h2 = jnp.maximum(h1 @ w2 + b2, 0.0)
    return h2 @ w3.T + b3


if __name__ == "__main__":
    key = jax.random.PRNGKey(0)
    pkey, xkey = jax.random.split(key)
    params = init_params(pkey)

    batch = 19   # deliberately not a multiple of the tile -> ragged last block
    x = jax.random.normal(xkey, (batch, INPUT_DIM), dtype=jnp.float32)
    ref = critic_reference(x, params)

    # (1) small tile -> multi-step grid with a ragged last block, f32 input
    #     (cast to bf16 inside the kernel).
    v_small_tile = jax.block_until_ready(critic_forward(x, params, batch_tile=8))
    # (2) default large-tile config, single ragged block, bf16 x at the boundary.
    v_default = jax.block_until_ready(
        critic_forward(x.astype(jnp.bfloat16), params))

    assert v_small_tile.shape == (batch, 1)
    assert v_default.shape == (batch, 1)

    # bf16 matmuls (f32 accumulation) vs. the pure-f32 reference.
    err1 = float(jnp.max(jnp.abs(v_small_tile - ref)))
    err2 = float(jnp.max(jnp.abs(v_default - ref)))
    assert err1 < 5e-2, f"mismatch (tile=8): max abs err {err1}"
    assert err2 < 5e-2, f"mismatch (default tile): max abs err {err2}"

    print("KERNEL_OK")
</pallas_src>

<mosaic_0001>
module attributes {stable_mosaic.version = 11 : i64} {
  func.func @_critic_kernel(%arg0: i32, %arg1: memref<8x259xf32, #tpu.memory_space<vmem>>, %arg2: memref<259x128xbf16, #tpu.memory_space<vmem>>, %arg3: memref<1x128xf32, #tpu.memory_space<vmem>>, %arg4: memref<128x128xbf16, #tpu.memory_space<vmem>>, %arg5: memref<1x128xf32, #tpu.memory_space<vmem>>, %arg6: memref<128x1xbf16, #tpu.memory_space<vmem>>, %arg7: memref<1x1xf32, #tpu.memory_space<vmem>>, %arg8: memref<8x1xf32, #tpu.memory_space<vmem>>) attributes {dimension_semantics = [#tpu.dimension_semantics<parallel>], iteration_bounds = array<i64: 3>, scalar_prefetch = 0 : i64, scratch_operands = 0 : i64, tpu.core_type = #tpu.core_type<tc>, window_params = [{transform_indices = @transform_0, window_bounds = array<i64: 8, 259>}, {pipeline_mode = #tpu.pipeline_mode<synchronous>, transform_indices = @transform_1, window_bounds = array<i64: 259, 128>}, {pipeline_mode = #tpu.pipeline_mode<synchronous>, transform_indices = @transform_2, window_bounds = array<i64: 1, 128>}, {pipeline_mode = #tpu.pipeline_mode<synchronous>, transform_indices = @transform_3, window_bounds = array<i64: 128, 128>}, {pipeline_mode = #tpu.pipeline_mode<synchronous>, transform_indices = @transform_4, window_bounds = array<i64: 1, 128>}, {pipeline_mode = #tpu.pipeline_mode<synchronous>, transform_indices = @transform_5, window_bounds = array<i64: 128, 1>}, {pipeline_mode = #tpu.pipeline_mode<synchronous>, transform_indices = @transform_6, window_bounds = array<i64: 1, 1>}, {transform_indices = @transform_7, window_bounds = array<i64: 8, 1>}]} {
    %c0 = arith.constant 0 : index
    %c0_0 = arith.constant 0 : index
    %0 = vector.load %arg1[%c0, %c0_0] : memref<8x259xf32, #tpu.memory_space<vmem>>, vector<8x259xf32>
    %1 = vector.extract_strided_slice %0 {offsets = [0, 0], sizes = [8, 256], strides = [1, 1]} : vector<8x259xf32> to vector<8x256xf32>
    %2 = arith.truncf %1 : vector<8x256xf32> to vector<8x256xbf16>
    %c0_1 = arith.constant 0 : index
    %c0_2 = arith.constant 0 : index
    %3 = vector.load %arg2[%c0_1, %c0_2] : memref<259x128xbf16, #tpu.memory_space<vmem>>, vector<256x128xbf16>
    %cst = arith.constant dense<0.000000e+00> : vector<8x128xf32>
    %4 = tpu.matmul %2, %3, %cst {dimension_numbers = #tpu.dot_dimension_numbers<[1], [0], [0], [1], [0, 0, 1, 1], [], []>} : vector<8x256xbf16>, vector<256x128xbf16>, vector<8x128xf32> -> vector<8x128xf32>
    %5 = vector.extract_strided_slice %0 {offsets = [0, 256], sizes = [8, 1], strides = [1, 1]} : vector<8x259xf32> to vector<8x1xf32>
    %c256 = arith.constant 256 : index
    %c0_3 = arith.constant 0 : index
    %6 = vector.load %arg2[%c256, %c0_3] : memref<259x128xbf16, #tpu.memory_space<vmem>>, vector<1x128xbf16>
    %7 = vector.shape_cast %6 : vector<1x128xbf16> to vector<128xbf16>
    %8 = arith.extf %7 : vector<128xbf16> to vector<128xf32>
    %9 = vector.shape_cast %8 : vector<128xf32> to vector<1x128xf32>
    %10 = vector.broadcast %5 : vector<8x1xf32> to vector<8x128xf32>
    %11 = vector.broadcast %9 : vector<1x128xf32> to vector<8x128xf32>
    %12 = arith.mulf %10, %11 : vector<8x128xf32>
    %13 = arith.addf %4, %12 : vector<8x128xf32>
    %14 = vector.extract_strided_slice %0 {offsets = [0, 257], sizes = [8, 1], strides = [1, 1]} : vector<8x259xf32> to vector<8x1xf32>
    %c257 = arith.constant 257 : index
    %c0_4 = arith.constant 0 : index
    %15 = vector.load %arg2[%c257, %c0_4] : memref<259x128xbf16, #tpu.memory_space<vmem>>, vector<1x128xbf16>
    %16 = vector.shape_cast %15 : vector<1x128xbf16> to vector<128xbf16>
    %17 = arith.extf %16 : vector<128xbf16> to vector<128xf32>
    %18 = vector.shape_cast %17 : vector<128xf32> to vector<1x128xf32>
    %19 = vector.broadcast %14 : vector<8x1xf32> to vector<8x128xf32>
    %20 = vector.broadcast %18 : vector<1x128xf32> to vector<8x128xf32>
    %21 = arith.mulf %19, %20 : vector<8x128xf32>
    %22 = arith.addf %13, %21 : vector<8x128xf32>
    %23 = vector.extract_strided_slice %0 {offsets = [0, 258], sizes = [8, 1], strides = [1, 1]} : vector<8x259xf32> to vector<8x1xf32>
    %c258 = arith.constant 258 : index
    %c0_5 = arith.constant 0 : index
    %24 = vector.load %arg2[%c258, %c0_5] : memref<259x128xbf16, #tpu.memory_space<vmem>>, vector<1x128xbf16>
    %25 = vector.shape_cast %24 : vector<1x128xbf16> to vector<128xbf16>
    %26 = arith.extf %25 : vector<128xbf16> to vector<128xf32>
    %27 = vector.shape_cast %26 : vector<128xf32> to vector<1x128xf32>
    %28 = vector.broadcast %23 : vector<8x1xf32> to vector<8x128xf32>
    %29 = vector.broadcast %27 : vector<1x128xf32> to vector<8x128xf32>
    %30 = arith.mulf %28, %29 : vector<8x128xf32>
    %31 = arith.addf %22, %30 : vector<8x128xf32>
    %c0_6 = arith.constant 0 : index
    %c0_7 = arith.constant 0 : index
    %32 = vector.load %arg3[%c0_6, %c0_7] : memref<1x128xf32, #tpu.memory_space<vmem>>, vector<1x128xf32>
    %33 = vector.broadcast %32 : vector<1x128xf32> to vector<8x128xf32>
    %34 = arith.addf %31, %33 : vector<8x128xf32>
    %cst_8 = arith.constant 0.000000e+00 : f32
    %35 = vector.broadcast %cst_8 : f32 to vector<8x128xf32>
    %36 = arith.maximumf %34, %35 : vector<8x128xf32>
    %37 = arith.truncf %36 : vector<8x128xf32> to vector<8x128xbf16>
    %c0_9 = arith.constant 0 : index
    %c0_10 = arith.constant 0 : index
    %38 = vector.load %arg4[%c0_9, %c0_10] : memref<128x128xbf16, #tpu.memory_space<vmem>>, vector<128x128xbf16>
    %cst_11 = arith.constant dense<0.000000e+00> : vector<8x128xf32>
    %39 = tpu.matmul %37, %38, %cst_11 {dimension_numbers = #tpu.dot_dimension_numbers<[1], [0], [0], [1], [0, 0, 1, 1], [], []>} : vector<8x128xbf16>, vector<128x128xbf16>, vector<8x128xf32> -> vector<8x128xf32>
    %c0_12 = arith.constant 0 : index
    %c0_13 = arith.constant 0 : index
    %40 = vector.load %arg5[%c0_12, %c0_13] : memref<1x128xf32, #tpu.memory_space<vmem>>, vector<1x128xf32>
    %41 = vector.broadcast %40 : vector<1x128xf32> to vector<8x128xf32>
    %42 = arith.addf %39, %41 : vector<8x128xf32>
    %cst_14 = arith.constant 0.000000e+00 : f32
    %43 = vector.broadcast %cst_14 : f32 to vector<8x128xf32>
    %44 = arith.maximumf %42, %43 : vector<8x128xf32>
    %45 = arith.truncf %44 : vector<8x128xf32> to vector<8x128xbf16>
    %c0_15 = arith.constant 0 : index
    %c0_16 = arith.constant 0 : index
    %46 = vector.load %arg6[%c0_15, %c0_16] : memref<128x1xbf16, #tpu.memory_space<vmem>>, vector<128x1xbf16>
    %cst_17 = arith.constant dense<0.000000e+00> : vector<8x1xf32>
    %47 = tpu.matmul %45, %46, %cst_17 {dimension_numbers = #tpu.dot_dimension_numbers<[1], [0], [0], [1], [0, 0, 1, 1], [], []>} : vector<8x128xbf16>, vector<128x1xbf16>, vector<8x1xf32> -> vector<8x1xf32>
    %c0_18 = arith.constant 0 : index
    %c0_19 = arith.constant 0 : index
    %48 = vector.load %arg7[%c0_18, %c0_19] : memref<1x1xf32, #tpu.memory_space<vmem>>, vector<1x1xf32>
    %49 = vector.broadcast %48 : vector<1x1xf32> to vector<8x1xf32>
    %50 = arith.addf %47, %49 : vector<8x1xf32>
    %c0_20 = arith.constant 0 : index
    %c0_21 = arith.constant 0 : index
    %51 = vector.load %arg8[%c0_20, %c0_21] : memref<8x1xf32, #tpu.memory_space<vmem>>, vector<8x1xf32>
    tpu.vector_store %arg8[%c0_20, %c0_21], %50 {strides = array<i32>} : memref<8x1xf32, #tpu.memory_space<vmem>>, vector<8x1xf32>,
    return
  }
  func.func @transform_0(%arg0: i32) -> (i32, i32) {
    %c0_i32 = arith.constant 0 : i32
    %c0_i32_0 = arith.constant 0 : i32
    return %arg0, %c0_i32 : i32, i32
  }
  func.func @transform_1(%arg0: i32) -> (i32, i32) {
    %c0_i32 = arith.constant 0 : i32
    %c0_i32_0 = arith.constant 0 : i32
    %c0_i32_1 = arith.constant 0 : i32
    return %c0_i32, %c0_i32_0 : i32, i32
  }
  func.func @transform_2(%arg0: i32) -> (i32, i32) {
    %c0_i32 = arith.constant 0 : i32
    %c0_i32_0 = arith.constant 0 : i32
    %c0_i32_1 = arith.constant 0 : i32
    return %c0_i32, %c0_i32_0 : i32, i32
  }
  func.func @transform_3(%arg0: i32) -> (i32, i32) {
    %c0_i32 = arith.constant 0 : i32
    %c0_i32_0 = arith.constant 0 : i32
    %c0_i32_1 = arith.constant 0 : i32
    return %c0_i32, %c0_i32_0 : i32, i32
  }
  func.func @transform_4(%arg0: i32) -> (i32, i32) {
    %c0_i32 = arith.constant 0 : i32
    %c0_i32_0 = arith.constant 0 : i32
    %c0_i32_1 = arith.constant 0 : i32
    return %c0_i32, %c0_i32_0 : i32, i32
  }
  func.func @transform_5(%arg0: i32) -> (i32, i32) {
    %c0_i32 = arith.constant 0 : i32
    %c0_i32_0 = arith.constant 0 : i32
    %c0_i32_1 = arith.constant 0 : i32
    return %c0_i32, %c0_i32_0 : i32, i32
  }
  func.func @transform_6(%arg0: i32) -> (i32, i32) {
    %c0_i32 = arith.constant 0 : i32
    %c0_i32_0 = arith.constant 0 : i32
    %c0_i32_1 = arith.constant 0 : i32
    return %c0_i32, %c0_i32_0 : i32, i32
  }
  func.func @transform_7(%arg0: i32) -> (i32, i32) {
    %c0_i32 = arith.constant 0 : i32
    %c0_i32_0 = arith.constant 0 : i32
    return %arg0, %c0_i32 : i32, i32
  }
}

</mosaic_0001>

<bundles_post_ra>
// kernel: critic_forward.1
= control target key start
LH: loop header
LB: loop body
LE: loop exit
PB: predicated region body
PF: predicated region fallthrough
CT: control target
= control target key end

     0   :  { %s1006_s26 = smov 0   ;;  %s1153_s0 = inlined_call_operand.vmem [shape: f32[19,259], index: 0, kind: input, shape index: {}]   ;;  %s1154_s1 = inlined_call_operand.vmem [shape: bf16[259,128], index: 1, kind: input, shape index: {}]   ;;  %s1155_s2 = inlined_call_operand.vmem [shape: f32[1,128], index: 2, kind: input, shape index: {}]   ;;  %s1156_s3 = inlined_call_operand.vmem [shape: bf16[128,128], index: 3, kind: input, shape index: {}]   ;;  %s1157_s4 = inlined_call_operand.vmem [shape: f32[1,128], index: 4, kind: input, shape index: {}]   ;;  %s1158_s5 = inlined_call_operand.vmem [shape: bf16[128,1], index: 5, kind: input, shape index: {}]   ;;  %s1159_s6 = inlined_call_operand.<no memory space> [shape: f32[1,1], index: 6, kind: input, shape index: {}]   ;;  %s1160_s7 = inlined_call_operand.vmem [shape: f32[19,1], index: 7, kind: output, shape index: {}]  }
   0x1   :  { %v12_v0 = vstv %s1159_s6 }
   0x2   :  { %13 = vst [vmem:[#allocation2] sm:$0x1] %v12_v0 }
   0x3 LB: > { %s776_s27 = sadd.s32 4294967295, %s956_s26   ;;  %p780_p0 = scmp.ge.s32.totalorder %s956_s26, 1  ;;  %s956_s26 = sphi %s1006_s26, %s19_s26  }
   0x4   : > { %p239_p1 = scmp.lt.s32.totalorder %s956_s26, 4 }
   0x6   : > { %p240_p2 = pnand %p780_p0, %p239_p1 }
   0x7   : > { %p270_p3 = scmp.lt.s32.totalorder (!%p240_p2), %s776_s27, 2 }
   0x8   : > { %243 = sbr.rel (%p240_p2) target bundleno = 653 (0x28d), region = 48 }
   0xd   : > { %v918_v1 = vld [vmem:[%s1154_s1 + $0x78] sm:$0xff]   ;;  %v920_v3 = vld [vmem:[%s1154_s1 + $0x70] sm:$0xff]   ;;  %v958_v4 = vmov 0   ;;  %v922_v6 = vld [vmem:[%s1154_s1 + $0x68] sm:$0xff]   ;;  %s1162_s27 = smov (!%p270_p3, %s776_s27), 2  ;;  %v959_v8 = vmov 2   ;;  %v324_v40 = vlaneseq }
   0xe   : > { %v919_v2 = vld [vmem:[%s1154_s1 + $0x38] sm:$0xff]   ;;  %820 = vmatprep.subr.bf16.mxu0 %v918_v1  ;;  %914 = vset.pattern.permute.xlu0 %v958_v4  ;;  %v921_v5 = vld [vmem:[%s1154_s1 + $0x30] sm:$0xff]   ;;  %v923_v7 = vld [vmem:[%s1154_s1 + $0x28] sm:$0xff]   ;;  %v960_v10 = vmov 0.0   ;;  %s900_s18 = smul.u32 24, %s1162_s27  ;;  %v961_v23 = vmov 1  }
   0xf   : > { %821 = vmatpush3.bf16.msra.mxu0 %v919_v2  ;;  %916 = vset.pattern.permute.xlu1 %v959_v8  ;;  %v924_v9 = vld [vmem:[%s1154_s1 + $0x60] sm:$0xff]   ;;  %v926_v12 = vld [vmem:[%s1154_s1 + $0x58] sm:$0xff]   ;;  %v928_v14 = vld [vmem:[%s1154_s1 + $0x50] sm:$0xff]   ;;  %vm962_vm0 = vmmov 0   ;;  %v325_v41 = vshrl.u32 %v324_v40, 7  ;;  %s782_s14 = sshll.u32 %s1162_s27, 3 }
  0x10   : > { %822 = vmatprep.subr.bf16.mxu0 %v920_v3  ;;  %860 = vmatprep.subr.bf16.mxu1 %v960_v10  ;;  %v925_v11 = vld [vmem:[%s1154_s1 + $0x20] sm:$0xff]   ;;  %s274_s25 = scalar_lea.vmem %s1153_s0, %s900_s18  ;;  %v927_v13 = vld [vmem:[%s1154_s1 + $0x18] sm:$0xff]   ;;  %v929_v19 = vld [vmem:[%s1154_s1 + $0x10] sm:$0xff]   ;;  %s278_s17 = scalar_lea.vmem %s1160_s7, %s782_s14  ;;  %vm721_vm1 = vcmask 7168  }
  0x11   : > { %v281_v15 = vld [vmem:[%s274_s25 + $0x8] sm:$0xff]  ;;  %v282_v16 = vld [vmem:[%s274_s25 + $0x10] sm:$0xff]  ;;  %v934_v18 = vld [vmem:[%s1156_s3 + $0x38] sm:$0xff]   ;;  %876 = vmatprep.mubr.msk.bf16.mxu1 %vm962_vm0, %v960_v10  ;;  %v326_v46 = vsub.s32 0, %v325_v41  ;;  %v471_v47 = vsub.s32 1, %v325_v41  ;;  %v483_v49 = vsub.s32 2, %v325_v41 }
  0x12   : > { %v284_v17 = vpack.c.bf16 %v281_v15, %v281_v15  ;;  %321 = vperm.xlu0 %914, %v282_v16   ;;  %478 = vperm.xlu1 %916, %v282_v16   ;;  %v930_v20 = vld [vmem:[%s1154_s1 + $0x48] sm:$0xff]   ;;  %v935_v21 = vld [vmem:[%s1156_s3 + $0x30] sm:$0xff]   ;;  %v932_v24 = vld [vmem:[%s1154_s1 + $0x40] sm:$0xff]  }
  0x13   : > { %823 = vmatpush3.bf16.msra.mxu0 %v921_v5  ;;  %861 = vmatpush3.bf16.msra.mxu1 %v934_v18  ;;  %v931_v22 = vld [vmem:[%s1154_s1 + $0x8] sm:$0xff]   ;;  %v933_v26 = vld [vmem:[%s1154_s1] sm:$0xff]   ;;  %v938_v30 = vld [vmem:[%s1156_s3 + $0x18] sm:$0xff]  }
  0x14   : > { %824 = vmatprep.subr.bf16.mxu0 %v922_v6  ;;  %457 = vmatprep.mubr.bf16.mxu0 %v284_v17  ;;  %v936_v25 = vld [vmem:[%s1156_s3 + $0x28] sm:$0xff]   ;;  %v280_v27 = vld [vmem:[%s274_s25] sm:$0xff]  ;;  %v939_v31 = vld [vmem:[%s1156_s3 + $0x10] sm:$0xff]  }
  0x15   : > { %862 = vmatprep.subr.bf16.mxu1 %v960_v10  ;;  %v937_v28 = vld [vmem:[%s1156_s3 + $0x20] sm:$0xff]   ;;  %v283_v29 = vpack.c.bf16 %v280_v27, %v280_v27  ;;  %v940_v32 = vld [vmem:[%s1156_s3 + $0x8] sm:$0xff]   ;;  %v942_v34 = vld [vmem:[%s1158_s5 + $0x38] sm:$0xff]  }
  0x16   : > { %915 = vset.pattern.permute.xlu0 %v961_v23  ;;  %v941_v33 = vld [vmem:[%s1156_s3] sm:$0xff]   ;;  %v943_v35 = vld [vmem:[%s1158_s5 + $0x30] sm:$0xff]   ;;  %v944_v36 = vld [vmem:[%s1158_s5 + $0x28] sm:$0xff]  }
  0x17   : > { %825 = vmatpush3.bf16.msra.mxu0 %v923_v7  ;;  %466 = vperm.xlu0 %915, %v282_v16   ;;  %v945_v37 = vld [vmem:[%s1158_s5 + $0x20] sm:$0xff]   ;;  %v946_v38 = vld [vmem:[%s1158_s5 + $0x18] sm:$0xff]   ;;  %v947_v39 = vld [vmem:[%s1158_s5 + $0x10] sm:$0xff]  }
  0x18   : > { %826 = vmatprep.subr.bf16.mxu0 %v924_v9  ;;  %863 = vmatpush3.bf16.msra.mxu1 %v935_v21  ;;  %v317_v42 = vld [vmem:[%s1154_s1 + $0x80] sm:$0x1]  ;;  %v475_v44 = vld [vmem:[%s1154_s1 + $0x80] sm:$0x2]  ;;  %v948_v6 = vld [vmem:[%s1158_s5 + $0x8] sm:$0xff]  }
  0x19   : > { %864 = vmatprep.subr.bf16.mxu1 %v960_v10  ;;  %v318_v45 = vunpack.c.l.bf16 %v317_v42  ;;  %v476_v48 = vunpack.c.l.bf16 %v475_v44  ;;  %v799_v1 = vld [vmem:[%s1155_s2] ss:$0 sm:$0xff] }
  0x1a   : > { %v949_v7 = vld [vmem:[%s1158_s5] sm:$0xff]  }
  0x1b   : > { %827 = vmatpush3.bf16.msra.mxu0 %v925_v11  ;;  %917 = vset.pattern.permute.xlu0 %v959_v8  ;;  %v327_v50 = vrot.slane %v318_v45, %v326_v46  ;;  %v472_v51 = vrot.slane %v318_v45, %v471_v47  ;;  %v484_v54 = vrot.slane %v476_v48, %v483_v49  ;;  %v800_v8 = vld [vmem:[%s1157_s4] ss:$0 sm:$0xff] }
  0x1c   : > { %828 = vmatprep.subr.bf16.mxu0 %v926_v12  ;;  %865 = vmatpush3.bf16.msra.mxu1 %v936_v25  ;;  %v809_v17 = vld [vmem:[#allocation2] ss:$0 sm:$0xff] }
  0x1d   : > { %866 = vmatprep.subr.bf16.mxu1 %v960_v10 }
  0x1f   : > { %829 = vmatpush3.bf16.msra.mxu0 %v927_v13 }
  0x20   : > { %830 = vmatprep.subr.bf16.mxu0 %v928_v14  ;;  %867 = vmatpush3.bf16.msra.mxu1 %v937_v28 }
  0x21   : > { %868 = vmatprep.subr.bf16.mxu1 %v960_v10 }
  0x23   : > { %831 = vmatpush3.bf16.msra.mxu0 %v929_v19 }
  0x24   : > { %832 = vmatprep.subr.bf16.mxu0 %v930_v20  ;;  %869 = vmatpush3.bf16.msra.mxu1 %v938_v30 }
  0x25   : > { %870 = vmatprep.subr.bf16.mxu1 %v960_v10 }
  0x27   : > { %833 = vmatpush3.bf16.msra.mxu0 %v931_v22 }
  0x28   : > { %834 = vmatprep.subr.bf16.mxu0 %v932_v24  ;;  %871 = vmatpush3.bf16.msra.mxu1 %v939_v31 }
  0x29   : > { %872 = vmatprep.subr.bf16.mxu1 %v960_v10 }
  0x2b   : > { %835 = vmatpush3.bf16.msra.mxu0 %v933_v26 }
  0x2c   : > { %880 = vmatprep.subr.bf16.mxu0 %v960_v10  ;;  %873 = vmatpush3.bf16.msra.mxu1 %v940_v32 }
  0x2d   : > { %874 = vmatprep.subr.bf16.mxu1 %v960_v10 }
  0x2e   : > { %458 = vmatmul.mubr.bf16.vlgmr.msra.gmra.mxu0 %v283_v29 }
  0x2f   : > { %896 = vmatprep.mubr.msk.bf16.mxu0 %vm962_vm0, %v960_v10  ;;  %881 = vmatpush3.bf16.msra.mxu0 %v942_v34 }
  0x30   : > { %875 = vmatpush3.bf16.msra.mxu1 %v941_v33  ;;  %882 = vmatprep.subr.bf16.mxu0 %v960_v10 }
  0x33   : > { %883 = vmatpush3.bf16.msra.mxu0 %v943_v35 }
  0x34   : > { %884 = vmatprep.subr.bf16.mxu0 %v960_v10 }
  0x37   : > { %885 = vmatpush3.bf16.msra.mxu0 %v944_v36 }
  0x38   : > { %886 = vmatprep.subr.bf16.mxu0 %v960_v10 }
  0x3b   : > { %887 = vmatpush3.bf16.msra.mxu0 %v945_v37 }
  0x3c   : > { %888 = vmatprep.subr.bf16.mxu0 %v960_v10 }
  0x3f   : > { %889 = vmatpush3.bf16.msra.mxu0 %v946_v38 }
  0x40   : > { %890 = vmatprep.subr.bf16.mxu0 %v960_v10 }
  0x43   : > { %891 = vmatpush3.bf16.msra.mxu0 %v947_v39 }
  0x44   : > { %892 = vmatprep.subr.bf16.mxu0 %v960_v10 }
  0x47   : > { %893 = vmatpush3.bf16.msra.mxu0 %v948_v6 }
  0x48   : > { %894 = vmatprep.subr.bf16.mxu0 %v960_v10 }
  0x4b   : > { %895 = vmatpush3.bf16.msra.mxu0 %v949_v7 }
  0x8d   : > { %v322_v43 = vpop.permute.xlu0 %321  ;;  %v479_v56 = vpop.permute.xlu1 %478 }
  0x8e   : > { %v328_v57 = vmul.f32 %v327_v50, %v322_v43  ;;  %v485_v62 = vmul.f32 %v484_v54, %v479_v56 }
  0x92   : > { %v467_v53 = vpop.permute.xlu0 %466 }
  0x93   : > { %v473_v59 = vmul.f32 %v472_v51, %v467_v53 }
  0xee   : > { %v836_v52 = vpop.f32.mrf.mxu0 }
  0xf0   : > { %v837_v55 = vpop.f32.mrf.mxu0 }
  0xf1   : > { %v838_v58 = vadd.f32 %v837_v55, %v836_v52 }
  0xf2   : > { %v839_v60 = vpop.f32.mrf.mxu0 }
  0xf3   : > { %v460_v61 = vadd.f32 %v838_v58, %v328_v57 }
  0xf4   : > { %v840_v63 = vpop.f32.mrf.mxu0 }
  0xf5   : > { %v474_v0 = vadd.f32 %v473_v59, %v460_v61 }
  0xf7   : > { %v486_v2 = vadd.f32 %v485_v62, %v474_v0 }
  0xf9   : > { %v494_v3 = vadd.f32 %v799_v1, %v486_v2 }
  0xfb   : > { %v495_v4 = vmax.f32 %v494_v3, 0.0 }
  0xfd   : > { %v496_v5 = vpack.c.bf16 %v495_v4, %v495_v4 }
  0xff   : > { %877 = vmatmul.mubr.bf16.vlgmr.msra.gmra.mxu1 %v496_v5 }
 0x1bf   : > { %v602_v9 = vpop.f32.mrf.mxu1 }
 0x1c0   : > { %v603_v11 = vadd.f32 %v800_v8, %v602_v9 }
 0x1c1   : > { %v878_v12 = vpop.f32.mrf.mxu1 }
 0x1c2   : > { %v608_v13 = vmax.f32 %v603_v11, 0.0 }
 0x1c3   : > { %v605_v14 = vpop.f32.mrf.mxu1 }
 0x1c4   : > { %v609_v15 = vpack.c.bf16 %v608_v13, %v608_v13 }
 0x1c5   : > { %v879_v16 = vpop.f32.mrf.mxu1 }
 0x1c6   : > { %897 = vmatmul.mubr.bf16.vlgmr.msra.gmra.mxu0 %v609_v15 }
 0x286   : > { %v715_v10 = vpop.f32.mrf.mxu0 }
 0x287   : > { %v716_v18 = vadd.f32 %v809_v17, %v715_v10 }
 0x288   : > { %v898_v19 = vpop.f32.mrf.mxu0 }
 0x289   : > { %722 = vst.msk [vmem:[%s278_s17] sm:$0xff] %vm721_vm1, %v716_v18 }
 0x28a   : > { %v718_v20 = vpop.f32.mrf.mxu0 }
 0x28c   : > { %v899_v21 = vpop.f32.mrf.mxu0 }
 0x28d PF: > { %s19_s26 = sadd.s32 1, %s956_s26  }
 0x28e   : > { %p16_p4 = scmp.ge.s32.totalorder %s19_s26, 5  }
 0x290   :  { %18 = sbr.rel (!%p16_p4) target bundleno = 3 (0x3), region = 78 }

</bundles_post_ra>
